<compile_context>
chip_gen: v7x
topology: tpu7x:2x2x1
jax: 0.10.0
libtpu: 0.0.40
codegen_flags: <defaults>
</compile_context>

<pallas_src>
import functools

import jax
import jax.numpy as jnp
from jax.experimental import pallas as pl
from jax.experimental.pallas import tpu as pltpu


# ----------------------------------------------------------------------------
# DoReFa weight quantization (tanh -> normalize by global max-abs -> round).
# Plain JAX: the weight is ~1.2 KB, a dedicated kernel launch costs more than
# the math, and this fuses into the banded-weight einsum below.
# ----------------------------------------------------------------------------
def dorefa_quantize(w, k_bits):
    t = jnp.tanh(w).astype(jnp.float32)
    maxabs = jnp.maximum(jnp.max(jnp.abs(t)), 1e-12)   # guard: all-zero weight (ref would NaN)
    scale = (2.0 ** k_bits) - 1.0
    q = jnp.round(scale * (t / (2.0 * maxabs) + 0.5)) / scale   # quantize_k
    return 2.0 * q - 1.0


# ----------------------------------------------------------------------------
# Fused KxK conv (stride 1, dilation 1, groups 1) + folded-BN bias + SiLU.
#   x_ref : (B, Hp, Wp*C1)    bf16  padded images, W and C flattened on lanes
#   w_ref : (K, Wp*C1, W*C2)  bf16  banded per-kh weight (kw shifts + BN scale folded)
#   b_ref : (1, W*C2)         f32   folded BatchNorm bias, tiled over W
#   o_ref : (B, H, W*C2)      f32   lane-dense output
# ----------------------------------------------------------------------------
def _conv_bias_silu_kernel(x_ref, w_ref, b_ref, o_ref, *, H, K):
    B = o_ref.shape[0]
    acc = None
    for kh in range(K):                                  # unrolled: K matmuls total
        # Static ref slices (zero-cost views); stack B images along M (sublanes).
        rows = [x_ref[n, kh:kh + H, :] for n in range(B)]
        lhs = rows[0] if B == 1 else jnp.concatenate(rows, axis=0)   # (B*H, Wp*C1)
        d = jnp.dot(lhs, w_ref[kh], preferred_element_type=jnp.float32)
        acc = d if acc is None else acc + d              # f32 accumulation
    y = acc + b_ref[...]                                 # folded BatchNorm bias
    y = y * jax.nn.sigmoid(y)                            # SiLU
    for n in range(B):                                   # sublane-aligned stores (H % 8 == 0)
        o_ref[n] = y[n * H:(n + 1) * H, :].astype(o_ref.dtype)


def _images_per_grid_step(n_images):
    """v7x (2 TCs/chip) and v4/v5p megacore profit from sharding the image axis
    across cores via dimension_semantics=("parallel",); single-TC v5e/v6e do
    better stacking all images into one grid step (larger matmul M, one fewer
    ~0.35 us grid-step overhead)."""
    try:
        kind = jax.devices()[0].device_kind.lower()
    except Exception:
        kind = ""
    multi_tc = ("v7" in kind) or ("v4" in kind) or ("v5p" in kind)
    return 1 if multi_tc else n_images


def conv_bn_silu(x_nhwc, w_banded, bias_row, *, K, pad):
    N, H, W, C1 = x_nhwc.shape
    WC2 = w_banded.shape[-1]
    C2 = WC2 // W
    Hp, Wp = H + 2 * pad, W + 2 * pad

    # TODO(synk): at production sizes handle the halo in-kernel instead of a
    # wrapper-side jnp.pad (extra HBM round trip of the activation).
    xp = jnp.pad(x_nhwc, ((0, 0), (pad, pad), (pad, pad), (0, 0)))
    x2d = xp.reshape(N, Hp, Wp * C1).astype(jnp.bfloat16)        # bf16 MXU operand

    B = _images_per_grid_step(N)
    out2d = pl.pallas_call(
        functools.partial(_conv_bias_silu_kernel, H=H, K=K),
        out_shape=jax.ShapeDtypeStruct((N, H, WC2), jnp.float32),
        grid=(N // B,),
        in_specs=[
            pl.BlockSpec((B, Hp, Wp * C1), lambda n: (n, 0, 0)),
            pl.BlockSpec((K, Wp * C1, WC2), lambda n: (0, 0, 0)),
            pl.BlockSpec((1, WC2), lambda n: (0, 0)),
        ],
        out_specs=pl.BlockSpec((B, H, WC2), lambda n: (n, 0, 0)),
        compiler_params=pltpu.CompilerParams(dimension_semantics=("parallel",)),
    )(x2d, w_banded, bias_row)
    return out2d.reshape(N, H, W, C2)


# ----------------------------------------------------------------------------
# Full module forward: quantize(weight)*bn_scale -> conv2d -> +bn_bias -> SiLU.
# ----------------------------------------------------------------------------
def conv_with_bitwidth_forward(x_nchw, weight_oihw, bn_mean, bn_var, bn_gamma,
                               bn_beta, *, bitwidth, pad, eps=1e-5):
    C2, C1, K, _ = weight_oihw.shape
    N, _, H, W = x_nchw.shape
    Wp = W + 2 * pad

    # Fold BatchNorm (inference) into a per-channel scale/bias.
    s = bn_gamma * jax.lax.rsqrt(bn_var + eps)                    # (C2,)
    bias = bn_beta - bn_mean * s                                  # (C2,)

    # DoReFa-quantize the weight and apply the BN scale (plain JAX, tiny tensor).
    wq = dorefa_quantize(weight_oihw, bitwidth) * s[:, None, None, None]  # (C2,C1,K,K)
    wq_t = jnp.transpose(wq, (2, 3, 1, 0))                        # (kh, kw, C1, C2)

    # Banded per-kh weight: fold the kw column shifts into the matmul RHS so the
    # kernel's LHS is simply rows kh:kh+H of the padded image.
    #   w_banded[kh, p*C1+c, q*C2+o] = wq_t[kh, p-q, c, o]  if 0 <= p-q < K else 0
    sel = (jnp.arange(Wp)[None, :, None]
           == jnp.arange(W)[None, None, :] + jnp.arange(K)[:, None, None])
    w_banded = jnp.einsum("kpq,hkco->hpcqo", sel.astype(jnp.float32), wq_t)
    w_banded = w_banded.reshape(K, Wp * C1, W * C2).astype(jnp.bfloat16)

    bias_row = jnp.tile(bias, W).reshape(1, W * C2).astype(jnp.float32)

    # NCHW <-> NHWC at the boundary.  TODO(synk): keep NHWC end-to-end at scale.
    x_nhwc = jnp.transpose(x_nchw, (0, 2, 3, 1))
    out_nhwc = conv_bn_silu(x_nhwc, w_banded, bias_row, K=K, pad=pad)
    return jnp.transpose(out_nhwc, (0, 3, 1, 2))


if __name__ == "__main__":
    # Module config: Conv_with_bitwidth(c1=4, c2=8, k=3, s=1, p=None -> autopad=1,
    #                                   g=1, d=1, act=True(SiLU), bitwidth=8)
    N, C1, H, W = 2, 4, 16, 16
    C2, K, bitwidth = 8, 3, 8
    pad = (K - 1) // 2        # autopad(3, None, 1) = 1
    eps = 1e-5

    key = jax.random.PRNGKey(0)
    kx, kw_, km, kv, kg, kb = jax.random.split(key, 6)
    x_nchw = jax.random.normal(kx, (N, C1, H, W), jnp.float32)
    weight = jax.random.normal(kw_, (C2, C1, K, K), jnp.float32) * 0.1
    # Deterministic BatchNorm2d parameters / running stats (inference mode).
    bn_gamma = jax.random.uniform(kg, (C2,), minval=0.5, maxval=1.5)
    bn_beta = jax.random.normal(kb, (C2,)) * 0.1
    bn_mean = jax.random.normal(km, (C2,)) * 0.1
    bn_var = jax.random.uniform(kv, (C2,), minval=0.5, maxval=1.5)

    out = conv_with_bitwidth_forward(x_nchw, weight, bn_mean, bn_var,
                                     bn_gamma, bn_beta,
                                     bitwidth=bitwidth, pad=pad, eps=eps)
    out = jax.block_until_ready(out)
    assert out.shape == (N, C2, H, W)

    # Shared pieces for the references.
    wq = dorefa_quantize(weight, bitwidth)
    s = bn_gamma * jax.lax.rsqrt(bn_var + eps)
    bias = bn_beta - bn_mean * s

    # Reference 1: matched precision (bf16 operands, f32 accumulation, folded BN)
    # -- catches kernel bugs at tight tolerance.
    conv_m = jax.lax.conv_general_dilated(
        x_nchw.astype(jnp.bfloat16),
        (wq * s[:, None, None, None]).astype(jnp.bfloat16),
        window_strides=(1, 1), padding=((pad, pad), (pad, pad)),
        dimension_numbers=("NCHW", "OIHW", "NCHW"),
        preferred_element_type=jnp.float32)
    ref_m = conv_m + bias[None, :, None, None]
    ref_m = ref_m * jax.nn.sigmoid(ref_m)
    assert jnp.allclose(out, ref_m, atol=2e-3, rtol=2e-3), "mismatch vs matched-precision ref"

    # Reference 2: full-f32 module semantics (quantize -> conv -> BN(eval) -> SiLU).
    # The module's @autocast(True) runs the conv in half precision, so a
    # bf16-level tolerance is the faithful comparison here.
    conv_f = jax.lax.conv_general_dilated(
        x_nchw, wq, window_strides=(1, 1), padding=((pad, pad), (pad, pad)),
        dimension_numbers=("NCHW", "OIHW", "NCHW"))
    ref_f = ((conv_f - bn_mean[None, :, None, None])
             * (bn_gamma[None, :, None, None]
                * jax.lax.rsqrt(bn_var[None, :, None, None] + eps))
             + bn_beta[None, :, None, None])
    ref_f = ref_f * jax.nn.sigmoid(ref_f)
    assert jnp.allclose(out, ref_f, atol=1e-1, rtol=5e-2), "mismatch vs f32 reference"

    print("KERNEL_OK")
</pallas_src>

<mosaic_0001>
module attributes {stable_mosaic.version = 11 : i64} {
  func.func @_conv_bias_silu_kernel(%arg0: i32, %arg1: memref<2x18x72xbf16, #tpu.memory_space<vmem>>, %arg2: memref<3x72x128xbf16, #tpu.memory_space<vmem>>, %arg3: memref<1x128xf32, #tpu.memory_space<vmem>>, %arg4: memref<2x16x128xf32, #tpu.memory_space<vmem>>) attributes {dimension_semantics = [#tpu.dimension_semantics<parallel>], iteration_bounds = array<i64: 1>, scalar_prefetch = 0 : i64, scratch_operands = 0 : i64, tpu.core_type = #tpu.core_type<tc>, window_params = [{transform_indices = @transform_0, window_bounds = array<i64: 2, 18, 72>}, {pipeline_mode = #tpu.pipeline_mode<synchronous>, transform_indices = @transform_1, window_bounds = array<i64: 3, 72, 128>}, {pipeline_mode = #tpu.pipeline_mode<synchronous>, transform_indices = @transform_2, window_bounds = array<i64: 1, 128>}, {transform_indices = @transform_3, window_bounds = array<i64: 2, 16, 128>}]} {
    %c0 = arith.constant 0 : index
    %c0_0 = arith.constant 0 : index
    %c0_1 = arith.constant 0 : index
    %0 = vector.load %arg1[%c0, %c0_0, %c0_1] : memref<2x18x72xbf16, #tpu.memory_space<vmem>>, vector<1x16x72xbf16>
    %1 = vector.shape_cast %0 : vector<1x16x72xbf16> to vector<16x72xbf16>
    %c1 = arith.constant 1 : index
    %c0_2 = arith.constant 0 : index
    %c0_3 = arith.constant 0 : index
    %2 = vector.load %arg1[%c1, %c0_2, %c0_3] : memref<2x18x72xbf16, #tpu.memory_space<vmem>>, vector<1x16x72xbf16>
    %3 = vector.shape_cast %2 : vector<1x16x72xbf16> to vector<16x72xbf16>
    %4 = tpu.concatenate %1, %3 in 0 : vector<16x72xbf16>, vector<16x72xbf16> -> vector<32x72xbf16>
    %c0_4 = arith.constant 0 : index
    %c0_5 = arith.constant 0 : index
    %c0_6 = arith.constant 0 : index
    %5 = vector.load %arg2[%c0_4, %c0_5, %c0_6] : memref<3x72x128xbf16, #tpu.memory_space<vmem>>, vector<1x72x128xbf16>
    %6 = vector.shape_cast %5 : vector<1x72x128xbf16> to vector<72x128xbf16>
    %cst = arith.constant dense<0.000000e+00> : vector<32x128xf32>
    %7 = tpu.matmul %4, %6, %cst {dimension_numbers = #tpu.dot_dimension_numbers<[1], [0], [0], [1], [0, 0, 1, 1], [], []>} : vector<32x72xbf16>, vector<72x128xbf16>, vector<32x128xf32> -> vector<32x128xf32>
    %c0_7 = arith.constant 0 : index
    %c1_8 = arith.constant 1 : index
    %c0_9 = arith.constant 0 : index
    %8 = vector.load %arg1[%c0_7, %c1_8, %c0_9] : memref<2x18x72xbf16, #tpu.memory_space<vmem>>, vector<1x16x72xbf16>
    %9 = vector.shape_cast %8 : vector<1x16x72xbf16> to vector<16x72xbf16>
    %c1_10 = arith.constant 1 : index
    %c1_11 = arith.constant 1 : index
    %c0_12 = arith.constant 0 : index
    %10 = vector.load %arg1[%c1_10, %c1_11, %c0_12] : memref<2x18x72xbf16, #tpu.memory_space<vmem>>, vector<1x16x72xbf16>
    %11 = vector.shape_cast %10 : vector<1x16x72xbf16> to vector<16x72xbf16>
    %12 = tpu.concatenate %9, %11 in 0 : vector<16x72xbf16>, vector<16x72xbf16> -> vector<32x72xbf16>
    %c1_13 = arith.constant 1 : index
    %c0_14 = arith.constant 0 : index
    %c0_15 = arith.constant 0 : index
    %13 = vector.load %arg2[%c1_13, %c0_14, %c0_15] : memref<3x72x128xbf16, #tpu.memory_space<vmem>>, vector<1x72x128xbf16>
    %14 = vector.shape_cast %13 : vector<1x72x128xbf16> to vector<72x128xbf16>
    %cst_16 = arith.constant dense<0.000000e+00> : vector<32x128xf32>
    %15 = tpu.matmul %12, %14, %cst_16 {dimension_numbers = #tpu.dot_dimension_numbers<[1], [0], [0], [1], [0, 0, 1, 1], [], []>} : vector<32x72xbf16>, vector<72x128xbf16>, vector<32x128xf32> -> vector<32x128xf32>
    %16 = arith.addf %7, %15 : vector<32x128xf32>
    %c0_17 = arith.constant 0 : index
    %c2 = arith.constant 2 : index
    %c0_18 = arith.constant 0 : index
    %17 = vector.load %arg1[%c0_17, %c2, %c0_18] : memref<2x18x72xbf16, #tpu.memory_space<vmem>>, vector<1x16x72xbf16>
    %18 = vector.shape_cast %17 : vector<1x16x72xbf16> to vector<16x72xbf16>
    %c1_19 = arith.constant 1 : index
    %c2_20 = arith.constant 2 : index
    %c0_21 = arith.constant 0 : index
    %19 = vector.load %arg1[%c1_19, %c2_20, %c0_21] : memref<2x18x72xbf16, #tpu.memory_space<vmem>>, vector<1x16x72xbf16>
    %20 = vector.shape_cast %19 : vector<1x16x72xbf16> to vector<16x72xbf16>
    %21 = tpu.concatenate %18, %20 in 0 : vector<16x72xbf16>, vector<16x72xbf16> -> vector<32x72xbf16>
    %c2_22 = arith.constant 2 : index
    %c0_23 = arith.constant 0 : index
    %c0_24 = arith.constant 0 : index
    %22 = vector.load %arg2[%c2_22, %c0_23, %c0_24] : memref<3x72x128xbf16, #tpu.memory_space<vmem>>, vector<1x72x128xbf16>
    %23 = vector.shape_cast %22 : vector<1x72x128xbf16> to vector<72x128xbf16>
    %cst_25 = arith.constant dense<0.000000e+00> : vector<32x128xf32>
    %24 = tpu.matmul %21, %23, %cst_25 {dimension_numbers = #tpu.dot_dimension_numbers<[1], [0], [0], [1], [0, 0, 1, 1], [], []>} : vector<32x72xbf16>, vector<72x128xbf16>, vector<32x128xf32> -> vector<32x128xf32>
    %25 = arith.addf %16, %24 : vector<32x128xf32>
    %c0_26 = arith.constant 0 : index
    %c0_27 = arith.constant 0 : index
    %26 = vector.load %arg3[%c0_26, %c0_27] : memref<1x128xf32, #tpu.memory_space<vmem>>, vector<1x128xf32>
    %27 = vector.broadcast %26 : vector<1x128xf32> to vector<32x128xf32>
    %28 = arith.addf %25, %27 : vector<32x128xf32>
    %29 = arith.negf %28 : vector<32x128xf32>
    %30 = math.exp %29 : vector<32x128xf32>
    %cst_28 = arith.constant 1.000000e+00 : f32
    %31 = vector.broadcast %cst_28 : f32 to vector<32x128xf32>
    %32 = arith.addf %31, %30 : vector<32x128xf32>
    %33 = arith.divf %31, %32 : vector<32x128xf32>
    %34 = arith.mulf %28, %33 : vector<32x128xf32>
    %35 = vector.extract_strided_slice %34 {offsets = [0, 0], sizes = [16, 128], strides = [1, 1]} : vector<32x128xf32> to vector<16x128xf32>
    %c0_29 = arith.constant 0 : index
    %c0_30 = arith.constant 0 : index
    %c0_31 = arith.constant 0 : index
    %36 = vector.load %arg4[%c0_29, %c0_30, %c0_31] : memref<2x16x128xf32, #tpu.memory_space<vmem>>, vector<1x16x128xf32>
    %37 = vector.shape_cast %36 : vector<1x16x128xf32> to vector<16x128xf32>
    %38 = vector.shape_cast %35 : vector<16x128xf32> to vector<1x16x128xf32>
    tpu.vector_store %arg4[%c0_29, %c0_30, %c0_31], %38 {strides = array<i32>} : memref<2x16x128xf32, #tpu.memory_space<vmem>>, vector<1x16x128xf32>,
    %39 = vector.extract_strided_slice %34 {offsets = [16, 0], sizes = [16, 128], strides = [1, 1]} : vector<32x128xf32> to vector<16x128xf32>
    %c1_32 = arith.constant 1 : index
    %c0_33 = arith.constant 0 : index
    %c0_34 = arith.constant 0 : index
    %40 = vector.load %arg4[%c1_32, %c0_33, %c0_34] : memref<2x16x128xf32, #tpu.memory_space<vmem>>, vector<1x16x128xf32>
    %41 = vector.shape_cast %40 : vector<1x16x128xf32> to vector<16x128xf32>
    %42 = vector.shape_cast %39 : vector<16x128xf32> to vector<1x16x128xf32>
    tpu.vector_store %arg4[%c1_32, %c0_33, %c0_34], %42 {strides = array<i32>} : memref<2x16x128xf32, #tpu.memory_space<vmem>>, vector<1x16x128xf32>,
    return
  }
  func.func @transform_0(%arg0: i32) -> (i32, i32, i32) {
    %c0_i32 = arith.constant 0 : i32
    %c0_i32_0 = arith.constant 0 : i32
    %c0_i32_1 = arith.constant 0 : i32
    return %arg0, %c0_i32, %c0_i32_0 : i32, i32, i32
  }
  func.func @transform_1(%arg0: i32) -> (i32, i32, i32) {
    %c0_i32 = arith.constant 0 : i32
    %c0_i32_0 = arith.constant 0 : i32
    %c0_i32_1 = arith.constant 0 : i32
    %c0_i32_2 = arith.constant 0 : i32
    return %c0_i32, %c0_i32_0, %c0_i32_1 : i32, i32, i32
  }
  func.func @transform_2(%arg0: i32) -> (i32, i32) {
    %c0_i32 = arith.constant 0 : i32
    %c0_i32_0 = arith.constant 0 : i32
    %c0_i32_1 = arith.constant 0 : i32
    return %c0_i32, %c0_i32_0 : i32, i32
  }
  func.func @transform_3(%arg0: i32) -> (i32, i32, i32) {
    %c0_i32 = arith.constant 0 : i32
    %c0_i32_0 = arith.constant 0 : i32
    %c0_i32_1 = arith.constant 0 : i32
    return %arg0, %c0_i32, %c0_i32_0 : i32, i32, i32
  }
}

</mosaic_0001>

<bundles_post_ra>
// kernel: tpu_custom_call.1
= control target key start
LH: loop header
LB: loop body
LE: loop exit
PB: predicated region body
PF: predicated region fallthrough
CT: control target
= control target key end

     0   :  { %8 = vsyncpa [#allocation3], 0  ;;  %s736_s0 = inlined_call_operand.vmem [shape: bf16[2,18,72], index: 0, kind: input, shape index: {}]   ;;  %s737_s1 = inlined_call_operand.hbm [shape: bf16[3,72,128], index: 1, kind: input, shape index: {}]   ;;  %s738_s2 = inlined_call_operand.vmem [shape: f32[1,128], index: 2, kind: input, shape index: {}]   ;;  %s739_s3 = inlined_call_operand.hbm [shape: f32[2,16,128], index: 3, kind: output, shape index: {}]  }
   0x1   :  { %9 = vsyncpa [#allocation4], 0  ;;  %s643_s12 = smov [#allocation2]   ;;  %s595_s16 = scalar_lea.hbm %s737_s1, 1728 }
   0x2   :  { %s17_s13 = sshll.u32 %s643_s12, 4  ;;  %p596_p0 = scmp.ne.s32.totalorder %s737_s1, %s595_s16  ;;  %s18_s13 = int_to_ptr.vmem [resolvable:$true] %s17_s13 }
   0x3   :  { %p599_p1 = scmp.lt.u32.totalorder %s595_s16, %s737_s1 }
   0x5   :  { %p601_p2 = pnand %p599_p1, %p596_p0 }
   0x7   :  { %604 = shalt.err (!%p601_p2)
}
   0x8   :  { %s605_s21 = scalar_lea.vmem %s18_s13, 1728  ;;  %p610_p4 = scmp.lt.s32.totalorder %s18_s13, %s18_s13 }
   0x9   :  { %p606_p3 = scmp.ne.s32.totalorder %s18_s13, %s605_s21  ;;  %p611_p5 = scmp.lt.s32.totalorder %s605_s21, %s605_s21 }
   0xb   :  { %p612_p6 = por %p611_p5, %p610_p4 }
   0xd   :  { %p613_p7 = pnand %p612_p6, %p606_p3 }
   0xf   :  { %616 = shalt.err (!%p613_p7)
}
  0x10   :  { %s644_s22 = smov 64   ;;  %s645_s23 = smov 4  }
  0x11   :  { %23 = dma.hbm_to_vmem [thread:$0]  %s737_s1, 1728, %s18_s13, [#allocation3], %s644_s22, %s644_s22, %s645_s23  }
  0x12   :  { %639 = dma.done.wait [#allocation3], 1728  }
  0x13   :  { %640 = vsyncadd [#allocation3], 4294965568  ;;  %v558_v0 = vld [vmem:[#allocation2] sm:$0xff]   ;;  %v559_v1 = vld [vmem:[#allocation2 + $0x8] sm:$0xff]   ;;  %vm124_vm0 = vcmask 588800   ;;  %vm131_vm1 = vcmask 1043456  }
  0x14   :  { %513 = vmatprep.subr.bf16.mxu0 %v558_v0  ;;  %v560_v2 = vld [vmem:[#allocation2 + $0x10] sm:$0xff]   ;;  %v563_v3 = vld [vmem:[#allocation2 + $0x24] sm:$0xff]   ;;  %v31_v5 = vld [vmem:[%s736_s0 + $0x4] sm:$0xf]  ;;  %vm59_vm2 = vsmask.f32 7424 }
  0x15   :  { %514 = vmatpush3.bf16.msra.mxu0 %v558_v0  ;;  %v30_v4 = vld [vmem:[%s736_s0] sm:$0xf]  ;;  %499 = vmatprep.subr.bf16.mxu1 %v563_v3  ;;  %v561_v7 = vld [vmem:[#allocation2 + $0x18] sm:$0xff]   ;;  %v567_v8 = vld [vmem:[#allocation2 + $0x2c] sm:$0xff]   ;;  %vm272_vm3 = vcmask 1046528  }
  0x16   :  { %515 = vmatprep.subr.bf16.mxu0 %v559_v1  ;;  %v444_v6 = vcombine.low %v30_v4, %v31_v5  ;;  %500 = vmatpush3.bf16.msra.mxu1 %v563_v3  ;;  %v562_v9 = vld [vmem:[#allocation2 + $0x20] ss:$0 sps:$4 sm:$0xff]   ;;  %v267_v10 = vld [vmem:[%s736_s0] sm:$0xe]  ;;  %v442_v11 = vld [vmem:[%s736_s0 + $0xc] sm:$0xf] }
  0x17   :  { %v443_v12 = vld [vmem:[%s736_s0 + $0x10] sm:$0xf]  ;;  %501 = vmatprep.subr.bf16.mxu1 %v567_v8  ;;  %v573_v15 = vld [vmem:[#allocation2 + $0x3c] sm:$0xff]   ;;  %v464_v17 = vcombine.low %v267_v10, %v31_v5  ;;  %v216_v19 = vsel %vm131_vm1, %v562_v9, 0  ;;  %v566_v20 = vld [vmem:[#allocation2 + $0x48] sm:$0xff]  }
  0x18   :  { %523 = vmatprep.mubr.msk.bf16.mxu0 %vm124_vm0, %v444_v6  ;;  %v571_v13 = vld [vmem:[#allocation2 + $0x34] sm:$0xff]   ;;  %v445_v14 = vcombine.low %v442_v11, %v443_v12  ;;  %v63_v16 = vshll.u32 %v444_v6, 16  ;;  %v61_v18 = vshrl.u32 %v444_v6, 16  ;;  %v576_v23 = vld [vmem:[%s736_s0 + $0x8] ss:$0 sps:$4 sm:$0x11]  }
  0x19   :  { %516 = vmatpush3.bf16.msra.mxu0 %v559_v1  ;;  %v575_v25 = vld [vmem:[#allocation2 + $0x44] ss:$0 sps:$4 sm:$0xff]   ;;  %v273_v27 = vrot.slane %v464_v17, 1  ;;  %v68_v29 = vshll.u32 %v576_v23, 16  ;;  %v274_v31 = vrot.slane %v576_v23, 1  ;;  %v570_v32 = vld [vmem:[#allocation2 + $0x50] sm:$0xff]  }
  0x1a   :  { %517 = vmatprep.subr.bf16.mxu0 %v560_v2  ;;  %502 = vmatpush3.bf16.msra.mxu1 %v567_v8  ;;  %v65_v21 = vrot.slane %v63_v16, 1  ;;  %v78_v22 = vshll.u32 %v445_v14, 16  ;;  %v76_v24 = vshrl.u32 %v445_v14, 16  ;;  %v578_v30 = vld [vmem:[%s736_s0 + $0x14] ss:$0 sps:$4 sm:$0x11]  }
  0x1b   :  { %503 = vmatprep.subr.bf16.mxu1 %v571_v13  ;;  %v70_v33 = vrot.slane %v68_v29, 1  ;;  %v83_v35 = vshll.u32 %v578_v30, 16  ;;  %v133_v36 = vsel %vm131_vm1, %v575_v25, 0  ;;  %v275_v39 = vsel %vm272_vm3, %v273_v27, %v274_v31  ;;  %v572_v40 = vld [vmem:[#allocation2 + $0x58] sm:$0xff]   ;;  %v463_v42 = vld [vmem:[%s736_s0 + $0xc] sm:$0xe] }
  0x1c   :  { %v80_v26 = vrot.slane %v78_v22, 1  ;;  %v66_v28 = vor.u32 %v65_v21, %v61_v18  ;;  %v574_v43 = vld [vmem:[#allocation2 + $0x60] sm:$0xff]   ;;  %v465_v44 = vcombine.low %v463_v42, %v443_v12  ;;  %v577_v45 = vld [vmem:[#allocation2 + $0x68] ss:$0 sps:$4 sm:$0xff]   ;;  %v280_v47 = vrot.slane %v578_v30, 1 }
  0x1d   :  { %518 = vmatpush3.bf16.msra.mxu0 %v560_v2  ;;  %v85_v38 = vrot.slane %v83_v35, 1  ;;  %v326_v48 = vsel %vm131_vm1, %v577_v45, 0  ;;  %v473_v55 = vld [vmem:[%s738_s2] ss:$0 sm:$0xff]  ;;  %s646_s2 = smov [#allocation5]  }
  0x1e   :  { %519 = vmatprep.subr.bf16.mxu0 %v561_v7  ;;  %504 = vmatpush3.bf16.msra.mxu1 %v571_v13  ;;  %v81_v34 = vor.u32 %v80_v26, %v76_v24  ;;  %v71_v37 = vsel %vm59_vm2, %v66_v28, %v70_v33  ;;  %v279_v46 = vrot.slane %v465_v44, 1  ;;  %s430_s15 = sshll.u32 %s646_s2, 4  ;;  %s431_s15 = int_to_ptr.vmem [resolvable:$true] %s430_s15 }
  0x1f   :  { %505 = vmatprep.subr.bf16.mxu1 %v573_v15  ;;  %509 = vmatprep.mubr.msk.bf16.mxu1 %vm124_vm0, %v71_v37  ;;  %s617_s16 = scalar_lea.vmem %s431_s15, 512  ;;  %p622_p9 = scmp.lt.s32.totalorder %s431_s15, %s431_s15 }
  0x20   :  { %v86_v41 = vsel %vm59_vm2, %v81_v34, %v85_v38  ;;  %v281_v49 = vsel %vm272_vm3, %v279_v46, %v280_v47  ;;  %p618_p8 = scmp.ne.s32.totalorder %s431_s15, %s617_s16  ;;  %p623_p10 = scmp.lt.s32.totalorder %s617_s16, %s617_s16 }
  0x21   :  { %520 = vmatpush3.bf16.msra.mxu0 %v561_v7 }
  0x22   :  { %550 = vmatprep.subr.msk.bf16.mxu0 %vm131_vm1, %v562_v9  ;;  %506 = vmatpush3.bf16.msra.mxu1 %v573_v15  ;;  %p624_p11 = por %p623_p10, %p622_p9 }
  0x23   :  { %549 = vmatprep.subr.msk.bf16.mxu1 %vm131_vm1, %v575_v25 }
  0x24   :  { %p625_p12 = pnand %p624_p11, %p618_p8 }
  0x25   :  { %522 = vmatpush3.bf16.msra.mxu0 %v216_v19 }
  0x26   :  { %527 = vmatprep.subr.bf16.mxu0 %v566_v20  ;;  %508 = vmatpush3.bf16.msra.mxu1 %v133_v36 }
  0x28   :  { %524 = vmatmul.mubr.msk.bf16.vlgmr.msra.gmra.mrb[0].mxu0 %vm124_vm0, %v445_v14 }
  0x29   :  { %528 = vmatpush3.bf16.msra.mxu0 %v566_v20  ;;  %537 = vmatprep.mubr.msk.bf16.mxu0 %vm124_vm0, %v275_v39 }
  0x2a   :  { %529 = vmatprep.subr.bf16.mxu0 %v570_v32  ;;  %510 = vmatmul.mubr.msk.bf16.vlgmr.msra.gmra.mrb[0].mxu1 %vm124_vm0, %v86_v41 }
  0x2d   :  { %530 = vmatpush3.bf16.msra.mxu0 %v570_v32 }
  0x2e   :  { %531 = vmatprep.subr.bf16.mxu0 %v572_v40 }
  0x31   :  { %532 = vmatpush3.bf16.msra.mxu0 %v572_v40 }
  0x32   :  { %533 = vmatprep.subr.bf16.mxu0 %v574_v43 }
  0x35   :  { %534 = vmatpush3.bf16.msra.mxu0 %v574_v43 }
  0x36   :  { %551 = vmatprep.subr.msk.bf16.mxu0 %vm131_vm1, %v577_v45 }
  0x39   :  { %536 = vmatpush3.bf16.msra.mxu0 %v326_v48 }
  0x3c   :  { %538 = vmatmul.mubr.msk.bf16.vlgmr.msra.gmra.mrb[0].mxu0 %vm124_vm0, %v281_v49 }
  0xfd   :  { %v511_v50 = vpop.f32.mrb[0].mxu1 }
  0xfe   :  { %v169_v51 = vpop.f32.mrb[1].mxu1 }
  0xff   :  { %v512_v52 = vpop.f32.mrb[2].mxu1 }
 0x100   :  { %v172_v53 = vpop.f32.mrb[3].mxu1 }
 0x10f   :  { %v539_v54 = vpop.f32.mrb[0].mxu0 }
 0x110   :  { %v541_v56 = vadd.f32 %v539_v54, %v511_v50  ;;  %v362_v57 = vpop.f32.mrb[1].mxu0 }
 0x111   :  { %v542_v58 = vadd.f32 %v362_v57, %v169_v51  ;;  %v540_v59 = vpop.f32.mrb[2].mxu0 }
 0x112   :  { %v390_v60 = vadd.f32 %v541_v56, %v473_v55  ;;  %v543_v61 = vadd.f32 %v540_v59, %v512_v52  ;;  %v365_v62 = vpop.f32.mrb[3].mxu0 }
 0x113   :  { %v388_v63 = vadd.f32 %v542_v58, %v473_v55  ;;  %v544_v0 = vadd.f32 %v365_v62, %v172_v53 }
 0x114   :  { %v476_v1 = vmul.f32 -1.442695, %v390_v60  ;;  %v391_v2 = vadd.f32 %v543_v61, %v473_v55 }
 0x115   :  { %v474_v3 = vmul.f32 -1.442695, %v388_v63  ;;  %v389_v4 = vadd.f32 %v544_v0, %v473_v55 }
 0x116   :  { %579 = vpow2.f32 %v476_v1  ;;  %v477_v5 = vmul.f32 -1.442695, %v391_v2 }
 0x117   :  { %581 = vpow2.f32 %v474_v3  ;;  %v475_v6 = vmul.f32 -1.442695, %v389_v4 }
 0x118   :  { %583 = vpow2.f32 %v477_v5 }
 0x119   :  { %585 = vpow2.f32 %v475_v6 }
 0x120   :  { %v580_v7 = vpop.eup %579 }
 0x121   :  { %v582_v8 = vpop.eup %581  ;;  %v406_v9 = vadd.f32 1.0, %v580_v7 }
 0x122   :  { %v584_v10 = vpop.eup %583  ;;  %v404_v11 = vadd.f32 1.0, %v582_v8 }
 0x123   :  { %v586_v12 = vpop.eup %585  ;;  %587 = vrcp.f32 %v406_v9  ;;  %v407_v13 = vadd.f32 1.0, %v584_v10 }
 0x124   :  { %589 = vrcp.f32 %v404_v11  ;;  %v405_v14 = vadd.f32 1.0, %v586_v12 }
 0x125   :  { %591 = vrcp.f32 %v407_v13 }
 0x126   :  { %593 = vrcp.f32 %v405_v14 }
 0x12d   :  { %v588_v15 = vpop.eup %587 }
 0x12e   :  { %v590_v16 = vpop.eup %589  ;;  %v418_v17 = vmul.f32 %v588_v15, %v390_v60 }
 0x12f   :  { %v592_v18 = vpop.eup %591  ;;  %v416_v19 = vmul.f32 %v590_v16, %v388_v63 }
 0x130   :  { %v594_v20 = vpop.eup %593  ;;  %423 = vst [vmem:[#allocation5 + $0x10] sm:$0xff] %v418_v17  ;;  %v419_v21 = vmul.f32 %v592_v18, %v391_v2 }
 0x131   :  { %420 = vst [vmem:[#allocation5] sm:$0xff] %v416_v19  ;;  %v417_v22 = vmul.f32 %v594_v20, %v389_v4 }
 0x132   :  { %424 = vst [vmem:[#allocation5 + $0x18] sm:$0xff] %v419_v21 }
 0x133   :  { %421 = vst [vmem:[#allocation5 + $0x8] sm:$0xff] %v417_v22 }
 0x134   :  { %628 = shalt.err (!%p625_p12)
}
 0x135   :  { %s629_s19 = scalar_lea.hbm %s739_s3, 512 }
 0x136   :  { %p630_p13 = scmp.ne.s32.totalorder %s739_s3, %s629_s19  ;;  %p633_p0 = scmp.lt.u32.totalorder %s629_s19, %s739_s3 }
 0x138   :  { %p635_p1 = pnand %p633_p0, %p630_p13 }
 0x13a   :  { %638 = shalt.err (!%p635_p1)
}
 0x13b   :  { %s647_s24 = smov 128   ;;  %s648_s25 = smov 8  }
 0x13c   :  { %436 = dma.vmem_to_hbm [thread:$0]  %s431_s15, 512, %s739_s3, [#allocation4], %s647_s24, %s647_s24, %s648_s25  }
 0x13d   :  { %641 = dma.done.wait [#allocation4], 512  }
 0x13e   :  { %642 = vsyncadd [#allocation4], 4294966784 }
 0x13f   :  { %440 = vsyncpa [#allocation3], 1 }
 0x140   :  { %441 = vsyncpa [#allocation4], 1 }

</bundles_post_ra>
